<compile_context>
chip_gen: v6e
topology: v6e:2x2x1
jax: 0.10.0
libtpu: 0.0.40
codegen_flags: <defaults>
</compile_context>

<pallas_src>
import functools

import jax
import jax.numpy as jnp
from jax.experimental import pallas as pl
from jax.experimental.pallas import tpu as pltpu

LANES = 128
MAX_BLOCK_ROWS = 4096      # 4096 x 128 f32 = 2 MiB per input block
FOLD_ROWS = 64             # accumulator rows: 8 independent vreg add chains
NUM_CORE_SPLITS = 2        # leading "parallel" axis (2 TCs on v7x)


def _sublane_multiple(dtype) -> int:
    # Rows-per-tile for the second-to-last dim: f32 -> 8, bf16 -> 16, 8-bit -> 32.
    return max(8, 32 // jnp.dtype(dtype).itemsize)


def _round_up(x: int, m: int) -> int:
    return (x + m - 1) // m * m


def _smooth_k2_kernel(p_ref, l_ref, out_ref, acc_ref, *,
                      threshold, block_rows, fold_rows, total_blocks,
                      n_full_rows, rem_cols, tail_needs_mask, has_phantom):
    c = pl.program_id(0)          # parallel split (core axis)
    i = pl.program_id(1)          # sequential reduction axis
    steps = pl.num_programs(1)

    @pl.when(i == 0)
    def _():
        acc_ref[...] = jnp.zeros_like(acc_ref)

    block_id = c * steps + i

    def loss_block():
        # Cast after the (possibly narrow) load; compute in f32.
        p = p_ref[...].astype(jnp.float32)
        l = l_ref[...].astype(jnp.float32)
        # relu-square == k-less masked quadratic:
        #   where(x >= t, (x - t)^2, 0) == max(x - t, 0)^2
        d = jnp.maximum(jnp.abs(p - l) - threshold, 0.0)
        return d * d

    def fold(v):
        # Fold the block onto the (fold_rows, 128) accumulator tile:
        # fold_rows/8 independent vreg add chains (keeps the VPU pipelined).
        return v.reshape(block_rows // fold_rows, fold_rows, LANES).sum(axis=0)

    def accumulate_plain():
        acc_ref[...] += fold(loss_block())

    def accumulate_masked():
        # Tail block only: zero out zero-pad / out-of-bounds (garbage) elems
        # against the TRUE element count.
        loss = loss_block()
        row0 = block_id * block_rows
        row_ids = row0 + jax.lax.broadcasted_iota(jnp.int32, loss.shape, 0)
        col_ids = jax.lax.broadcasted_iota(jnp.int32, loss.shape, 1)
        valid = (row_ids < n_full_rows) | (
            (row_ids == n_full_rows) & (col_ids < rem_cols))
        acc_ref[...] += fold(jnp.where(valid, loss, 0.0))

    if tail_needs_mask:
        is_tail = block_id == total_blocks - 1
        plain = jnp.logical_not(is_tail)
        if has_phantom:
            # Phantom (clamped) steps past the real block range: skip entirely.
            plain = jnp.logical_and(plain, block_id < total_blocks)

        @pl.when(plain)
        def _():
            accumulate_plain()

        @pl.when(is_tail)
        def _():
            accumulate_masked()
    else:
        if has_phantom:
            @pl.when(block_id < total_blocks)
            def _():
                accumulate_plain()
        else:
            accumulate_plain()

    @pl.when(i == steps - 1)
    def _():
        out_ref[...] = acc_ref[...]


def smooth_k2_loss(predictions, labels, threshold=0.25, k=2):
    assert predictions.shape == labels.shape
    n = int(predictions.size)

    p = predictions.reshape(-1)
    l = labels.reshape(-1)

    mult = max(_sublane_multiple(p.dtype), _sublane_multiple(l.dtype))
    min_elems = mult * LANES
    padded = max(min_elems, _round_up(n, LANES))
    if padded != n:
        # Only copies for non-128-aligned or tiny inputs; tail is masked in-kernel.
        p = jnp.pad(p, (0, padded - n))
        l = jnp.pad(l, (0, padded - n))

    rows = padded // LANES
    p2 = p.reshape(rows, LANES)
    l2 = l.reshape(rows, LANES)

    block_rows = min(MAX_BLOCK_ROWS, (rows // mult) * mult)
    fold_rows = next(f for f in (FOLD_ROWS, 32, 16, 8) if block_rows % f == 0)
    total_blocks = pl.cdiv(rows, block_rows)
    n_splits = min(NUM_CORE_SPLITS, total_blocks)
    tiles_per_split = pl.cdiv(total_blocks, n_splits)
    has_phantom = (n_splits * tiles_per_split) != total_blocks
    # Any element covered by the grid beyond the true n (zero-pad or OOB rows)?
    tail_needs_mask = (total_blocks * block_rows * LANES) != n

    if has_phantom:
        def in_map(c, i):
            # Clamp so phantom steps re-read the last valid block; their
            # contribution is skipped in-kernel.
            return (jnp.minimum(c * tiles_per_split + i, total_blocks - 1), 0)
    else:
        def in_map(c, i):
            return (c * tiles_per_split + i, 0)

    kernel = functools.partial(
        _smooth_k2_kernel,
        threshold=float(threshold),
        block_rows=int(block_rows),
        fold_rows=int(fold_rows),
        total_blocks=int(total_blocks),
        n_full_rows=int(n // LANES),
        rem_cols=int(n % LANES),
        tail_needs_mask=bool(tail_needs_mask),
        has_phantom=bool(has_phantom),
    )

    bytes_accessed = (n * (predictions.dtype.itemsize + labels.dtype.itemsize)
                      + n_splits * fold_rows * LANES * 4)

    partials = pl.pallas_call(
        kernel,
        out_shape=jax.ShapeDtypeStruct((n_splits * fold_rows, LANES), jnp.float32),
        grid_spec=pltpu.PrefetchScalarGridSpec(
            num_scalar_prefetch=0,
            grid=(n_splits, tiles_per_split),
            in_specs=[
                pl.BlockSpec((block_rows, LANES), in_map),
                pl.BlockSpec((block_rows, LANES), in_map),
            ],
            out_specs=pl.BlockSpec((fold_rows, LANES), lambda c, i: (c, 0)),
            scratch_shapes=[pltpu.VMEM((fold_rows, LANES), jnp.float32)],
        ),
        compiler_params=pltpu.CompilerParams(
            dimension_semantics=("parallel", "arbitrary"),
        ),
        cost_estimate=pl.CostEstimate(
            flops=5 * n, transcendentals=0, bytes_accessed=bytes_accessed),
    )(p2, l2)

    # k hoisted out of the kernel; mean over the TRUE element count.
    return jnp.sum(partials) * (float(k) / float(n))


def smooth_k2_loss_ref(predictions, labels, threshold=0.25, k=2):
    x = jnp.abs(predictions - labels)
    mask = (x >= threshold).astype(x.dtype)
    loss = k * (x ** 2 - 2 * threshold * x + threshold ** 2) * mask
    return jnp.mean(loss)


if __name__ == "__main__":
    key = jax.random.PRNGKey(0)
    k1, k2 = jax.random.split(key)
    shape = (2, 4, 16, 16)  # NCHW, matching the PyTorch module's usage
    predictions = jax.random.normal(k1, shape, dtype=jnp.float32)
    labels = jax.random.normal(k2, shape, dtype=jnp.float32)

    out = smooth_k2_loss(predictions, labels, threshold=0.25, k=2)
    out = jax.block_until_ready(out)

    ref = smooth_k2_loss_ref(predictions, labels, threshold=0.25, k=2)
    assert jnp.allclose(out, ref, rtol=1e-5, atol=1e-5), (out, ref)
    print("KERNEL_OK")
</pallas_src>

<mosaic_0001>
module attributes {stable_mosaic.version = 11 : i64} {
  func.func @_smooth_k2_kernel(%arg0: i32, %arg1: i32, %arg2: memref<16x128xf32, #tpu.memory_space<vmem>>, %arg3: memref<16x128xf32, #tpu.memory_space<vmem>>, %arg4: memref<16x128xf32, #tpu.memory_space<vmem>>, %arg5: memref<16x128xf32, #tpu.memory_space<vmem>>) attributes {dimension_semantics = [#tpu.dimension_semantics<parallel>, #tpu.dimension_semantics<arbitrary>], iteration_bounds = array<i64: 1, 1>, scalar_prefetch = 0 : i64, scratch_operands = 1 : i64, tpu.core_type = #tpu.core_type<tc>, window_params = [{transform_indices = @transform_0, window_bounds = array<i64: 16, 128>}, {transform_indices = @transform_1, window_bounds = array<i64: 16, 128>}, {transform_indices = @transform_2, window_bounds = array<i64: 16, 128>}]} {
    %c0_i32 = arith.constant 0 : i32
    %0 = arith.cmpi eq, %arg1, %c0_i32 : i32
    %1 = arith.extui %0 : i1 to i32
    %c0_i32_0 = arith.constant 0 : i32
    %2 = arith.cmpi ne, %1, %c0_i32_0 : i32
    scf.if %2 {
      %cst_12 = arith.constant 0.000000e+00 : f32
      %20 = vector.broadcast %cst_12 : f32 to vector<16x128xf32>
      %c0_13 = arith.constant 0 : index
      %c0_14 = arith.constant 0 : index
      %21 = vector.load %arg5[%c0_13, %c0_14] : memref<16x128xf32, #tpu.memory_space<vmem>>, vector<16x128xf32>
      tpu.vector_store %arg5[%c0_13, %c0_14], %20 {strides = array<i32>} : memref<16x128xf32, #tpu.memory_space<vmem>>, vector<16x128xf32>,
    } else {
    }
    %c0 = arith.constant 0 : index
    %c0_1 = arith.constant 0 : index
    %3 = vector.load %arg5[%c0, %c0_1] : memref<16x128xf32, #tpu.memory_space<vmem>>, vector<16x128xf32>
    %c0_2 = arith.constant 0 : index
    %c0_3 = arith.constant 0 : index
    %4 = vector.load %arg2[%c0_2, %c0_3] : memref<16x128xf32, #tpu.memory_space<vmem>>, vector<16x128xf32>
    %c0_4 = arith.constant 0 : index
    %c0_5 = arith.constant 0 : index
    %5 = vector.load %arg3[%c0_4, %c0_5] : memref<16x128xf32, #tpu.memory_space<vmem>>, vector<16x128xf32>
    %6 = arith.subf %4, %5 : vector<16x128xf32>
    %7 = math.absf %6 : vector<16x128xf32>
    %cst = arith.constant 2.500000e-01 : f32
    %8 = vector.broadcast %cst : f32 to vector<16x128xf32>
    %9 = arith.subf %7, %8 : vector<16x128xf32>
    %cst_6 = arith.constant 0.000000e+00 : f32
    %10 = vector.broadcast %cst_6 : f32 to vector<16x128xf32>
    %11 = arith.maximumf %9, %10 : vector<16x128xf32>
    %12 = arith.mulf %11, %11 : vector<16x128xf32>
    %13 = vector.shape_cast %12 : vector<16x128xf32> to vector<1x16x128xf32>
    %cst_7 = arith.constant dense<0.000000e+00> : vector<16x128xf32>
    %14 = vector.multi_reduction <add>, %13, %cst_7 [0] : vector<1x16x128xf32> to vector<16x128xf32>
    %15 = arith.addf %3, %14 : vector<16x128xf32>
    %c0_8 = arith.constant 0 : index
    %c0_9 = arith.constant 0 : index
    %16 = vector.load %arg5[%c0_8, %c0_9] : memref<16x128xf32, #tpu.memory_space<vmem>>, vector<16x128xf32>
    tpu.vector_store %arg5[%c0_8, %c0_9], %15 {strides = array<i32>} : memref<16x128xf32, #tpu.memory_space<vmem>>, vector<16x128xf32>,
    %c0_i32_10 = arith.constant 0 : i32
    %17 = arith.cmpi eq, %arg1, %c0_i32_10 : i32
    %18 = arith.extui %17 : i1 to i32
    %c0_i32_11 = arith.constant 0 : i32
    %19 = arith.cmpi ne, %18, %c0_i32_11 : i32
    scf.if %19 {
      %c0_12 = arith.constant 0 : index
      %c0_13 = arith.constant 0 : index
      %20 = vector.load %arg5[%c0_12, %c0_13] : memref<16x128xf32, #tpu.memory_space<vmem>>, vector<16x128xf32>
      %c0_14 = arith.constant 0 : index
      %c0_15 = arith.constant 0 : index
      %21 = vector.load %arg4[%c0_14, %c0_15] : memref<16x128xf32, #tpu.memory_space<vmem>>, vector<16x128xf32>
      tpu.vector_store %arg4[%c0_14, %c0_15], %20 {strides = array<i32>} : memref<16x128xf32, #tpu.memory_space<vmem>>, vector<16x128xf32>,
    } else {
    }
    return
  }
  func.func @transform_0(%arg0: i32, %arg1: i32) -> (i32, i32) {
    %c1_i32 = arith.constant 1 : i32
    %0 = arith.muli %arg0, %c1_i32 : i32
    %1 = arith.addi %0, %arg1 : i32
    %c0_i32 = arith.constant 0 : i32
    %c0_i32_0 = arith.constant 0 : i32
    return %1, %c0_i32 : i32, i32
  }
  func.func @transform_1(%arg0: i32, %arg1: i32) -> (i32, i32) {
    %c1_i32 = arith.constant 1 : i32
    %0 = arith.muli %arg0, %c1_i32 : i32
    %1 = arith.addi %0, %arg1 : i32
    %c0_i32 = arith.constant 0 : i32
    %c0_i32_0 = arith.constant 0 : i32
    return %1, %c0_i32 : i32, i32
  }
  func.func @transform_2(%arg0: i32, %arg1: i32) -> (i32, i32) {
    %c0_i32 = arith.constant 0 : i32
    %c0_i32_0 = arith.constant 0 : i32
    return %arg0, %c0_i32 : i32, i32
  }
}

</mosaic_0001>

<bundles_post_ra>
// kernel: tpu_custom_call.1
= control target key start
LH: loop header
LB: loop body
LE: loop exit
PB: predicated region body
PF: predicated region fallthrough
CT: control target
= control target key end

     0   :  { %7 = vsyncpa [#allocation4], 0  ;;  %s216_s0 = inlined_call_operand.hbm [shape: f32[16,128], index: 0, kind: input, shape index: {}]   ;;  %s217_s1 = inlined_call_operand.hbm [shape: f32[16,128], index: 1, kind: input, shape index: {}]   ;;  %s218_s2 = inlined_call_operand.hbm [shape: f32[16,128], index: 2, kind: output, shape index: {}]  }
   0x1   :  { %8 = vsyncpa [#allocation7], 0 }
   0x2   :  { %9 = vsyncpa [#allocation5], 0  ;;  %s178_s9 = smov [#allocation3]  }
   0x3   :  { %s19_s10 = sshll.u32 %s178_s9, 4  ;;  %s20_s10 = int_to_ptr.vmem [resolvable:$true] %s19_s10 }
   0x4   :  { %s120_s11 = scalar_lea.vmem %s20_s10, 256  ;;  %p125_p1 = scmp.lt.s32.totalorder %s20_s10, %s20_s10 }
   0x5   :  { %p121_p0 = scmp.ne.s32.totalorder %s20_s10, %s120_s11  ;;  %p126_p2 = scmp.lt.s32.totalorder %s120_s11, %s120_s11 }
   0x7   :  { %p127_p3 = por %p126_p2, %p125_p1 }
   0x9   :  { %p128_p4 = pnand %p127_p3, %p121_p0 }
   0xb   :  { %131 = shalt.err (!%p128_p4)
}
   0xc   :  { %s179_s12 = smov 128   ;;  %s180_s13 = smov 8  }
   0xd   :  { %25 = dma.hbm_to_vmem [thread:$0]  %s216_s0, 256, %s20_s10, [#allocation4], %s179_s12, %s179_s12, %s180_s13  }
   0xe   :  { %s181_s16 = smov [#allocation6]  }
   0xf   :  { %s35_s17 = sshll.u32 %s181_s16, 4  ;;  %s36_s17 = int_to_ptr.vmem [resolvable:$true] %s35_s17 }
  0x10   :  { %s140_s18 = scalar_lea.vmem %s36_s17, 256  ;;  %p145_p6 = scmp.lt.s32.totalorder %s36_s17, %s36_s17 }
  0x11   :  { %p141_p5 = scmp.ne.s32.totalorder %s36_s17, %s140_s18  ;;  %p146_p7 = scmp.lt.s32.totalorder %s140_s18, %s140_s18 }
  0x13   :  { %p147_p8 = por %p146_p7, %p145_p6 }
  0x15   :  { %p148_p9 = pnand %p147_p8, %p141_p5 }
  0x17   :  { %151 = shalt.err (!%p148_p9)
}
  0x18   :  { %41 = dma.hbm_to_vmem [thread:$0]  %s217_s1, 256, %s36_s17, [#allocation7], %s179_s12, %s179_s12, %s180_s13  }
  0x19   :  { %172 = dma.done.wait [#allocation4], 256  }
  0x1a   :  { %173 = vsyncadd [#allocation4], 4294967040 }
  0x1b   :  { %174 = dma.done.wait [#allocation7], 256  }
  0x1c   :  { %175 = vsyncadd [#allocation7], 4294967040  ;;  %v60_v0 = vld [vmem:[#allocation3] sm:$0xff]  ;;  %v62_v1 = vld [vmem:[#allocation6] sm:$0xff]  ;;  %s182_s0 = smov [#allocation8]  }
  0x1d   :  { %v61_v2 = vld [vmem:[#allocation3 + $0x8] sm:$0xff]  ;;  %v64_v3 = vsub.f32 %v60_v0, %v62_v1  ;;  %v63_v4 = vld [vmem:[#allocation6 + $0x8] sm:$0xff]  ;;  %s92_s21 = sshll.u32 %s182_s0, 4  ;;  %s93_s21 = int_to_ptr.vmem [resolvable:$true] %s92_s21 }
  0x1e   :  { %v65_v5 = vsub.f32 %v61_v2, %v63_v4  ;;  %s152_s1 = scalar_lea.vmem %s93_s21, 256  ;;  %p157_p11 = scmp.lt.s32.totalorder %s93_s21, %s93_s21 }
  0x1f   :  { %v66_v6 = vand.u32 2147483647, %v64_v3  ;;  %p153_p10 = scmp.ne.s32.totalorder %s93_s21, %s152_s1  ;;  %p158_p12 = scmp.lt.s32.totalorder %s152_s1, %s152_s1 }
  0x20   :  { %v67_v7 = vand.u32 2147483647, %v65_v5 }
  0x21   :  { %v105_v8 = vadd.f32 -0.25, %v66_v6  ;;  %p159_p13 = por %p158_p12, %p157_p11 }
  0x22   :  { %v106_v9 = vadd.f32 -0.25, %v67_v7 }
  0x23   :  { %v70_v10 = vmax.f32 %v105_v8, 0.0  ;;  %p160_p0 = pnand %p159_p13, %p153_p10 }
  0x24   :  { %v71_v11 = vmax.f32 %v106_v9, 0.0 }
  0x25   :  { %v72_v12 = vmul.f32 %v70_v10, %v70_v10 }
  0x26   :  { %v73_v13 = vmul.f32 %v71_v11, %v71_v11 }
  0x27   :  { %85 = vst [vmem:[#allocation8] sm:$0xff] %v72_v12 }
  0x28   :  { %86 = vst [vmem:[#allocation8 + $0x8] sm:$0xff] %v73_v13 }
  0x29   :  { %163 = shalt.err (!%p160_p0)
}
  0x2a   :  { %98 = dma.vmem_to_hbm [thread:$0]  %s93_s21, 256, %s218_s2, [#allocation5], %s179_s12, %s179_s12, %s180_s13  }
  0x2b   :  { %176 = dma.done.wait [#allocation5], 256  }
  0x2c   :  { %177 = vsyncadd [#allocation5], 4294967040 }
  0x2d   :  { %102 = vsyncpa [#allocation4], 1 }
  0x2e   :  { %103 = vsyncpa [#allocation7], 1 }
  0x2f   :  { %104 = vsyncpa [#allocation5], 1 }

</bundles_post_ra>
